<compile_context>
chip_gen: v5e
topology: v5e:2x2
jax: 0.10.0
libtpu: 0.0.40
codegen_flags: <defaults>
</compile_context>

<pallas_src>
import functools
import math

import jax
import jax.numpy as jnp
from jax.experimental import pallas as pl
from jax.experimental.pallas import tpu as pltpu


def _layernorm_kernel(*refs, eps, d_hid, use_seg, affine):
    ix = 0
    x_ref = refs[ix]; ix += 1
    if use_seg:
        seg_ref = refs[ix]; ix += 1
    if affine:
        a_ref, b_ref = refs[ix], refs[ix + 1]; ix += 2
    o_ref = refs[ix]

    x = x_ref[...].astype(jnp.float32)                 # (rt, L)
    inv_n = jnp.float32(1.0 / d_hid)
    inv_nm1 = jnp.float32(1.0 / (d_hid - 1))           # torch.std is unbiased

    if use_seg:
        # Lane-packed layout: L = g * d_hid, seg is (L, L) block-diagonal 0/1.
        # v @ seg = per-segment sums, already broadcast across each segment.
        seg = seg_ref[...]                              # bf16 0/1 (exact)

        def seg_sum(v):
            # bf16 hi/lo split keeps the MXU segment sums at ~f32 accuracy.
            hi = v.astype(jnp.bfloat16)
            lo = (v - hi.astype(jnp.float32)).astype(jnp.bfloat16)
            s = jnp.dot(hi, seg, preferred_element_type=jnp.float32)
            return s + jnp.dot(lo, seg, preferred_element_type=jnp.float32)

        mean = seg_sum(x) * inv_n
        diff = x - mean
        ssq = seg_sum(diff * diff)
    else:
        mean = jnp.mean(x, axis=-1, keepdims=True)
        diff = x - mean
        ssq = jnp.sum(diff * diff, axis=-1, keepdims=True)

    sigma = jnp.sqrt(ssq * inv_nm1)
    denom = sigma + jnp.float32(eps)
    inv = pl.reciprocal(denom, approx=True)             # EUP slot, frees VALU
    inv = inv * (jnp.float32(2.0) - denom * inv)        # one Newton step
    out = diff * inv
    if affine:
        out = out * a_ref[...].astype(jnp.float32) + b_ref[...].astype(jnp.float32)
    o_ref[...] = out.astype(o_ref.dtype)


def _round_up(a, b):
    return ((a + b - 1) // b) * b


def layer_normalization(z, a_2=None, b_2=None, eps=0.001, affine=True,
                        row_tile=None, vmem_limit_bytes=48 * 1024 * 1024):
    """LayerNormalization forward with PyTorch-module semantics. z: (..., d_hid)."""
    d_hid = z.shape[-1]
    if d_hid == 1:
        return z                                        # module returns input unchanged

    orig_shape = z.shape
    rows = math.prod(orig_shape[:-1]) if len(orig_shape) > 1 else 1
    x2d = z.reshape(rows, d_hid)

    # ---- lane packing: make the block's last dim a full multiple of 128 ----
    if d_hid < 128 and 128 % d_hid == 0:
        g = 128 // d_hid                                # divisors of 128 -> powers of 2
    else:
        g = 1                                           # already lane-dense enough
    L = g * d_hid
    use_seg = g > 1

    # ---- row-tile selection: big tiles, never below the sublane minimum ----
    itemsize = jnp.dtype(z.dtype).itemsize
    sub = {4: 8, 2: 16, 1: 32}.get(itemsize, 8)
    if row_tile is None:
        target_tile_bytes = 2 * 1024 * 1024             # ~2 MiB input tile (DMA-bound regime)
        rt_cap = max(sub, min(4096, (target_tile_bytes // (L * itemsize)) // sub * sub))
    else:
        rt_cap = max(sub, row_tile // sub * sub)

    # pad only up to a multiple of g (and to one minimal tile for tiny inputs);
    # large non-aligned row counts are handled with a partial last block.
    packed_rows = _round_up(rows, g) // g
    if packed_rows < sub:
        packed_rows = sub
    rows_g = packed_rows * g
    if rows_g != rows:
        x2d = jnp.concatenate(
            [x2d, jnp.zeros((rows_g - rows, d_hid), dtype=z.dtype)], axis=0)
    xp = x2d.reshape(packed_rows, L)

    rt = min(rt_cap, (packed_rows // sub) * sub)        # multiple of sub, <= packed_rows
    grid = (pl.cdiv(packed_rows, rt),)                  # last block may be partial

    inputs = [xp]
    in_specs = [pl.BlockSpec((rt, L), lambda i: (i, 0))]
    if use_seg:
        seg_ids = jnp.arange(L, dtype=jnp.int32) // d_hid
        seg = (seg_ids[:, None] == seg_ids[None, :]).astype(jnp.bfloat16)
        inputs.append(seg)
        in_specs.append(pl.BlockSpec((L, L), lambda i: (0, 0)))
    if affine:
        if a_2 is None:
            a_2 = jnp.ones((d_hid,), dtype=z.dtype)
        if b_2 is None:
            b_2 = jnp.zeros((d_hid,), dtype=z.dtype)
        a_p = jnp.tile(a_2.reshape(1, d_hid), (1, g)).reshape(1, L)
        b_p = jnp.tile(b_2.reshape(1, d_hid), (1, g)).reshape(1, L)
        inputs += [a_p, b_p]
        in_specs += [pl.BlockSpec((1, L), lambda i: (0, 0)),
                     pl.BlockSpec((1, L), lambda i: (0, 0))]
    # else: no param DMA streams, no mul-add in the kernel.

    kernel = functools.partial(_layernorm_kernel, eps=float(eps), d_hid=d_hid,
                               use_seg=use_seg, affine=affine)

    outp = pl.pallas_call(
        kernel,
        out_shape=jax.ShapeDtypeStruct((packed_rows, L), z.dtype),
        grid_spec=pltpu.PrefetchScalarGridSpec(
            num_scalar_prefetch=0,
            grid=grid,
            in_specs=in_specs,
            out_specs=pl.BlockSpec((rt, L), lambda i: (i, 0)),
        ),
        compiler_params=pltpu.CompilerParams(
            dimension_semantics=("parallel",),          # shards tiles across v7x's 2 TCs
            vmem_limit_bytes=vmem_limit_bytes,          # 48 MiB: fits v7x, unlocks v5e/v6e
        ),
    )(*inputs)

    out2d = outp.reshape(rows_g, d_hid)[:rows]
    return out2d.reshape(orig_shape)


def _reference(z, a_2, b_2, eps, affine):
    z = z.astype(jnp.float32)
    mu = jnp.mean(z, axis=-1, keepdims=True)
    sigma = jnp.std(z, axis=-1, keepdims=True, ddof=1)  # unbiased, like torch.std
    out = (z - mu) / (sigma + eps)
    if affine:
        out = out * a_2.astype(jnp.float32) + b_2.astype(jnp.float32)
    return out


if __name__ == "__main__":
    key = jax.random.PRNGKey(0)
    k1, k2, k3 = jax.random.split(key, 3)
    eps = 0.001

    # Case 1: d_hid < 128 (lane-packed path), affine=True -- matches module default.
    batch, seq, d_hid = 2, 8, 32
    z = jax.random.normal(k1, (batch, seq, d_hid), dtype=jnp.float32)
    a_2 = jnp.ones((d_hid,), dtype=jnp.float32)    # nn.Parameter(torch.ones(d_hid))
    b_2 = jnp.zeros((d_hid,), dtype=jnp.float32)   # nn.Parameter(torch.zeros(d_hid))
    out = jax.block_until_ready(layer_normalization(z, a_2, b_2, eps=eps, affine=True))
    ref = _reference(z, a_2, b_2, eps, True)
    assert out.shape == z.shape and out.dtype == z.dtype
    assert float(jnp.max(jnp.abs(out - ref))) < 2e-4   # approx-recip + Newton ~1e-5 rel

    # Case 2: d_hid >= 128 (row-reduce path), affine=False (param DMAs skipped).
    d_hid2 = 256
    z2 = jax.random.normal(k2, (batch, seq, d_hid2), dtype=jnp.float32)
    out2 = jax.block_until_ready(layer_normalization(z2, eps=eps, affine=False))
    ref2 = _reference(z2, None, None, eps, False)
    assert float(jnp.max(jnp.abs(out2 - ref2))) < 2e-4

    # Case 3: bf16 input through the lane-packed path.
    z3 = jax.random.normal(k3, (batch, seq, d_hid), dtype=jnp.bfloat16)
    out3 = jax.block_until_ready(
        layer_normalization(z3, a_2.astype(jnp.bfloat16), b_2.astype(jnp.bfloat16),
                            eps=eps, affine=True))
    ref3 = _reference(z3, a_2, b_2, eps, True)
    assert out3.dtype == jnp.bfloat16
    assert float(jnp.max(jnp.abs(out3.astype(jnp.float32) - ref3))) < 5e-2

    # Case 4: d_hid == 1 -> identity shortcut of the module's forward().
    z4 = jax.random.normal(k1, (batch, seq, 1), dtype=jnp.float32)
    assert bool(jnp.all(layer_normalization(z4, eps=eps) == z4))

    print("KERNEL_OK")
</pallas_src>

<mosaic_0001>
module attributes {stable_mosaic.version = 11 : i64} {
  func.func @_layernorm_kernel(%arg0: i32, %arg1: memref<8x128xf32, #tpu.memory_space<vmem>>, %arg2: memref<128x128xbf16, #tpu.memory_space<vmem>>, %arg3: memref<1x128xf32, #tpu.memory_space<vmem>>, %arg4: memref<1x128xf32, #tpu.memory_space<vmem>>, %arg5: memref<8x128xf32, #tpu.memory_space<vmem>>) attributes {dimension_semantics = [#tpu.dimension_semantics<parallel>], iteration_bounds = array<i64: 1>, scalar_prefetch = 0 : i64, scratch_operands = 0 : i64, tpu.core_type = #tpu.core_type<tc>, window_params = [{transform_indices = @transform_0, window_bounds = array<i64: 8, 128>}, {pipeline_mode = #tpu.pipeline_mode<synchronous>, transform_indices = @transform_1, window_bounds = array<i64: 128, 128>}, {pipeline_mode = #tpu.pipeline_mode<synchronous>, transform_indices = @transform_2, window_bounds = array<i64: 1, 128>}, {pipeline_mode = #tpu.pipeline_mode<synchronous>, transform_indices = @transform_3, window_bounds = array<i64: 1, 128>}, {transform_indices = @transform_4, window_bounds = array<i64: 8, 128>}]} {
    %c0 = arith.constant 0 : index
    %c0_0 = arith.constant 0 : index
    %0 = vector.load %arg1[%c0, %c0_0] : memref<8x128xf32, #tpu.memory_space<vmem>>, vector<8x128xf32>
    %c0_1 = arith.constant 0 : index
    %c0_2 = arith.constant 0 : index
    %1 = vector.load %arg2[%c0_1, %c0_2] : memref<128x128xbf16, #tpu.memory_space<vmem>>, vector<128x128xbf16>
    %2 = arith.truncf %0 : vector<8x128xf32> to vector<8x128xbf16>
    %3 = arith.extf %2 : vector<8x128xbf16> to vector<8x128xf32>
    %4 = arith.subf %0, %3 : vector<8x128xf32>
    %5 = arith.truncf %4 : vector<8x128xf32> to vector<8x128xbf16>
    %cst = arith.constant dense<0.000000e+00> : vector<8x128xf32>
    %6 = tpu.matmul %2, %1, %cst {dimension_numbers = #tpu.dot_dimension_numbers<[1], [0], [0], [1], [0, 0, 1, 1], [], []>} : vector<8x128xbf16>, vector<128x128xbf16>, vector<8x128xf32> -> vector<8x128xf32>
    %cst_3 = arith.constant dense<0.000000e+00> : vector<8x128xf32>
    %7 = tpu.matmul %5, %1, %cst_3 {dimension_numbers = #tpu.dot_dimension_numbers<[1], [0], [0], [1], [0, 0, 1, 1], [], []>} : vector<8x128xbf16>, vector<128x128xbf16>, vector<8x128xf32> -> vector<8x128xf32>
    %8 = arith.addf %6, %7 : vector<8x128xf32>
    %cst_4 = arith.constant 3.125000e-02 : f32
    %9 = vector.broadcast %cst_4 : f32 to vector<8x128xf32>
    %10 = arith.mulf %8, %9 : vector<8x128xf32>
    %11 = arith.subf %0, %10 : vector<8x128xf32>
    %12 = arith.mulf %11, %11 : vector<8x128xf32>
    %13 = arith.truncf %12 : vector<8x128xf32> to vector<8x128xbf16>
    %14 = arith.extf %13 : vector<8x128xbf16> to vector<8x128xf32>
    %15 = arith.subf %12, %14 : vector<8x128xf32>
    %16 = arith.truncf %15 : vector<8x128xf32> to vector<8x128xbf16>
    %cst_5 = arith.constant dense<0.000000e+00> : vector<8x128xf32>
    %17 = tpu.matmul %13, %1, %cst_5 {dimension_numbers = #tpu.dot_dimension_numbers<[1], [0], [0], [1], [0, 0, 1, 1], [], []>} : vector<8x128xbf16>, vector<128x128xbf16>, vector<8x128xf32> -> vector<8x128xf32>
    %cst_6 = arith.constant dense<0.000000e+00> : vector<8x128xf32>
    %18 = tpu.matmul %16, %1, %cst_6 {dimension_numbers = #tpu.dot_dimension_numbers<[1], [0], [0], [1], [0, 0, 1, 1], [], []>} : vector<8x128xbf16>, vector<128x128xbf16>, vector<8x128xf32> -> vector<8x128xf32>
    %19 = arith.addf %17, %18 : vector<8x128xf32>
    %cst_7 = arith.constant 0.0322580636 : f32
    %20 = vector.broadcast %cst_7 : f32 to vector<8x128xf32>
    %21 = arith.mulf %19, %20 : vector<8x128xf32>
    %22 = math.sqrt %21 : vector<8x128xf32>
    %cst_8 = arith.constant 1.000000e-03 : f32
    %23 = vector.broadcast %cst_8 : f32 to vector<8x128xf32>
    %24 = arith.addf %22, %23 : vector<8x128xf32>
    %25 = tpu.reciprocal %24 {approx = true} : vector<8x128xf32> -> vector<8x128xf32>
    %26 = arith.mulf %24, %25 : vector<8x128xf32>
    %cst_9 = arith.constant 2.000000e+00 : f32
    %27 = vector.broadcast %cst_9 : f32 to vector<8x128xf32>
    %28 = arith.subf %27, %26 : vector<8x128xf32>
    %29 = arith.mulf %25, %28 : vector<8x128xf32>
    %30 = arith.mulf %11, %29 : vector<8x128xf32>
    %c0_10 = arith.constant 0 : index
    %c0_11 = arith.constant 0 : index
    %31 = vector.load %arg3[%c0_10, %c0_11] : memref<1x128xf32, #tpu.memory_space<vmem>>, vector<1x128xf32>
    %32 = vector.broadcast %31 : vector<1x128xf32> to vector<8x128xf32>
    %33 = arith.mulf %30, %32 : vector<8x128xf32>
    %c0_12 = arith.constant 0 : index
    %c0_13 = arith.constant 0 : index
    %34 = vector.load %arg4[%c0_12, %c0_13] : memref<1x128xf32, #tpu.memory_space<vmem>>, vector<1x128xf32>
    %35 = vector.broadcast %34 : vector<1x128xf32> to vector<8x128xf32>
    %36 = arith.addf %33, %35 : vector<8x128xf32>
    %c0_14 = arith.constant 0 : index
    %c0_15 = arith.constant 0 : index
    %37 = vector.load %arg5[%c0_14, %c0_15] : memref<8x128xf32, #tpu.memory_space<vmem>>, vector<8x128xf32>
    tpu.vector_store %arg5[%c0_14, %c0_15], %36 {strides = array<i32>} : memref<8x128xf32, #tpu.memory_space<vmem>>, vector<8x128xf32>,
    return
  }
  func.func @transform_0(%arg0: i32) -> (i32, i32) {
    %c0_i32 = arith.constant 0 : i32
    %c0_i32_0 = arith.constant 0 : i32
    return %arg0, %c0_i32 : i32, i32
  }
  func.func @transform_1(%arg0: i32) -> (i32, i32) {
    %c0_i32 = arith.constant 0 : i32
    %c0_i32_0 = arith.constant 0 : i32
    %c0_i32_1 = arith.constant 0 : i32
    return %c0_i32, %c0_i32_0 : i32, i32
  }
  func.func @transform_2(%arg0: i32) -> (i32, i32) {
    %c0_i32 = arith.constant 0 : i32
    %c0_i32_0 = arith.constant 0 : i32
    %c0_i32_1 = arith.constant 0 : i32
    return %c0_i32, %c0_i32_0 : i32, i32
  }
  func.func @transform_3(%arg0: i32) -> (i32, i32) {
    %c0_i32 = arith.constant 0 : i32
    %c0_i32_0 = arith.constant 0 : i32
    %c0_i32_1 = arith.constant 0 : i32
    return %c0_i32, %c0_i32_0 : i32, i32
  }
  func.func @transform_4(%arg0: i32) -> (i32, i32) {
    %c0_i32 = arith.constant 0 : i32
    %c0_i32_0 = arith.constant 0 : i32
    return %arg0, %c0_i32 : i32, i32
  }
}

</mosaic_0001>

<bundles_post_ra>
// kernel: tpu_custom_call.1
= control target key start
LH: loop header
LB: loop body
LE: loop exit
PB: predicated region body
PF: predicated region fallthrough
CT: control target
= control target key end

     0   :  { %9 = vsyncpa [#allocation3], 0  ;;  %s398_s0 = inlined_call_operand.hbm [shape: f32[8,128], index: 0, kind: input, shape index: {}]   ;;  %s399_s1 = inlined_call_operand.hbm [shape: bf16[128,128], index: 1, kind: input, shape index: {}]   ;;  %s400_s2 = inlined_call_operand.vmem [shape: f32[1,128], index: 2, kind: input, shape index: {}]   ;;  %s401_s3 = inlined_call_operand.vmem [shape: f32[1,128], index: 3, kind: input, shape index: {}]   ;;  %s402_s4 = inlined_call_operand.hbm [shape: f32[8,128], index: 4, kind: output, shape index: {}]  }
   0x1   :  { %10 = vsyncpa [#allocation6], 0 }
   0x2   :  { %11 = vsyncpa [#allocation4], 0  ;;  %s17_s17 = sshll.u32 %s398_s0, 4  ;;  %s353_s18 = smov [#allocation2]   ;;  %s18_s17 = int_to_ptr.hbm [resolvable:$true] %s17_s17 }
   0x3   :  { %s19_s19 = sshll.u32 %s353_s18, 4  ;;  %s27_s22 = sshll.u32 %s399_s1, 4  ;;  %s20_s19 = int_to_ptr.vmem [resolvable:$true] %s19_s19  ;;  %s28_s22 = int_to_ptr.hbm [resolvable:$true] %s27_s22 }
   0x4   :  { %22 = dma.hbm_to_vmem [thread:$0]  %s18_s17, 128, %s20_s19, [#allocation3]  }
   0x5   :  { %s354_s23 = smov [#allocation5]   ;;  %s355_s25 = smov 64  }
   0x6   :  { %s29_s24 = sshll.u32 %s354_s23, 4  ;;  %s356_s26 = smov 4   ;;  %s30_s24 = int_to_ptr.vmem [resolvable:$true] %s29_s24 }
   0x7   :  { %35 = dma.hbm_to_vmem [thread:$0]  %s28_s22, 1024, %s30_s24, [#allocation6], %s355_s25, %s355_s25, %s356_s26  }
   0x8   :  { %347 = dma.done.wait [#allocation3], 128  }
   0x9   :  { %348 = vsyncadd [#allocation3], 4294967168 }
   0xa   :  { %349 = dma.done.wait [#allocation6], 1024  }
   0xb   :  { %350 = vsyncadd [#allocation6], 4294966272  ;;  %v263_v0 = vld [vmem:[#allocation5 + $0x38] sm:$0xff]  ;;  %v262_v1 = vld [vmem:[#allocation5 + $0x30] sm:$0xff]  ;;  %s357_s29 = smov [#allocation7]   ;;  %s213_s7 = sshll.u32 %s402_s4, 4  ;;  %s214_s7 = int_to_ptr.hbm [resolvable:$true] %s213_s7 }
   0xc   :  { %117 = vmatpush.bf16.msra.mxu0 %v263_v0  ;;  %130 = vmatpush.bf16.msra.mxu1 %v263_v0  ;;  %v261_v2 = vld [vmem:[#allocation5 + $0x28] sm:$0xff]  ;;  %v260_v3 = vld [vmem:[#allocation5 + $0x20] sm:$0xff]  ;;  %v259_v4 = vld [vmem:[#allocation5 + $0x18] sm:$0xff]  ;;  %s211_s30 = sshll.u32 %s357_s29, 4  ;;  %s212_s30 = int_to_ptr.vmem [resolvable:$true] %s211_s30 }
   0xd   :  { %163 = vmatpush.bf16.msra.mxu3 %v263_v0  ;;  %150 = vmatpush.bf16.msra.mxu2 %v263_v0  ;;  %v48_v5 = vld [vmem:[#allocation2] sm:$0xff]  ;;  %v258_v7 = vld [vmem:[#allocation5 + $0x10] sm:$0xff]  ;;  %v257_v9 = vld [vmem:[#allocation5 + $0x8] sm:$0xff] }
   0xe   :  { %v65_v6 = vpack.c.bf16 %v48_v5, %v48_v5  ;;  %v256_v11 = vld [vmem:[#allocation5] sm:$0xff]  ;;  %v269_v46 = vld [vmem:[%s400_s2] ss:$0 sm:$0xff] }
   0xf   :  { %v270_v48 = vld [vmem:[%s401_s3] ss:$0 sm:$0xff] }
  0x10   :  { %118 = vmatpush.bf16.msra.mxu0 %v262_v1  ;;  %131 = vmatpush.bf16.msra.mxu1 %v262_v1  ;;  %v66_v8 = vunpack.c.l.bf16 %v65_v6 }
  0x11   :  { %164 = vmatpush.bf16.msra.mxu3 %v262_v1  ;;  %151 = vmatpush.bf16.msra.mxu2 %v262_v1 }
  0x12   :  { %v67_v10 = vsub.f32 %v48_v5, %v66_v8 }
  0x14   :  { %119 = vmatpush.bf16.msra.mxu0 %v261_v2  ;;  %132 = vmatpush.bf16.msra.mxu1 %v261_v2  ;;  %v68_v12 = vpack.c.bf16 %v67_v10, %v67_v10 }
  0x15   :  { %165 = vmatpush.bf16.msra.mxu3 %v261_v2  ;;  %152 = vmatpush.bf16.msra.mxu2 %v261_v2 }
  0x18   :  { %120 = vmatpush.bf16.msra.mxu0 %v260_v3  ;;  %133 = vmatpush.bf16.msra.mxu1 %v260_v3 }
  0x19   :  { %166 = vmatpush.bf16.msra.mxu3 %v260_v3  ;;  %153 = vmatpush.bf16.msra.mxu2 %v260_v3 }
  0x1c   :  { %121 = vmatpush.bf16.msra.mxu0 %v259_v4  ;;  %134 = vmatpush.bf16.msra.mxu1 %v259_v4 }
  0x1d   :  { %167 = vmatpush.bf16.msra.mxu3 %v259_v4  ;;  %154 = vmatpush.bf16.msra.mxu2 %v259_v4 }
  0x20   :  { %122 = vmatpush.bf16.msra.mxu0 %v258_v7  ;;  %135 = vmatpush.bf16.msra.mxu1 %v258_v7 }
  0x21   :  { %168 = vmatpush.bf16.msra.mxu3 %v258_v7  ;;  %155 = vmatpush.bf16.msra.mxu2 %v258_v7 }
  0x24   :  { %123 = vmatpush.bf16.msra.mxu0 %v257_v9  ;;  %136 = vmatpush.bf16.msra.mxu1 %v257_v9 }
  0x25   :  { %169 = vmatpush.bf16.msra.mxu3 %v257_v9  ;;  %156 = vmatpush.bf16.msra.mxu2 %v257_v9 }
  0x28   :  { %124 = vmatpush.bf16.msra.mxu0 %v256_v11  ;;  %137 = vmatpush.bf16.msra.mxu1 %v256_v11 }
  0x29   :  { %170 = vmatpush.bf16.msra.mxu3 %v256_v11  ;;  %157 = vmatpush.bf16.msra.mxu2 %v256_v11 }
  0x2b   :  { %125 = vmatmul.bf16.vlgmr.msra.gmra.mxu0 %v68_v12  ;;  %138 = vmatmul.bf16.vlgmr.msra.gmra.mxu1 %v65_v6 }
  0xa8   :  { %v126_v13 = vpop.f32.mrf.mxu0  ;;  %v139_v14 = vpop.f32.mrf.mxu1 }
  0xa9   :  { %v140_v15 = vadd.f32 %v139_v14, %v126_v13 }
  0xab   :  { %v143_v16 = vmul.f32 0.03125, %v140_v15 }
  0xad   :  { %v144_v17 = vsub.f32 %v48_v5, %v143_v16 }
  0xaf   :  { %v145_v18 = vmul.f32 %v144_v17, %v144_v17 }
  0xb0   :  { %v128_v19 = vpop.f32.mrf.mxu0  ;;  %v141_v20 = vpop.f32.mrf.mxu1 }
  0xb1   :  { %v146_v21 = vpack.c.bf16 %v145_v18, %v145_v18 }
  0xb3   :  { %v147_v22 = vunpack.c.l.bf16 %v146_v21  ;;  %171 = vmatmul.bf16.vlgmr.msra.gmra.mxu3 %v146_v21 }
  0xb5   :  { %v148_v23 = vsub.f32 %v145_v18, %v147_v22 }
  0xb7   :  { %v149_v24 = vpack.c.bf16 %v148_v23, %v148_v23 }
  0xb9   :  { %158 = vmatmul.bf16.vlgmr.msra.gmra.mxu2 %v149_v24 }
 0x136   :  { %v172_v25 = vpop.f32.mrf.mxu3 }
 0x13c   :  { %v159_v26 = vpop.f32.mrf.mxu2 }
 0x13d   :  { %v173_v27 = vadd.f32 %v172_v25, %v159_v26 }
 0x13e   :  { %v174_v28 = vpop.f32.mrf.mxu3 }
 0x13f   :  { %v176_v29 = vmul.f32 0.032258064, %v173_v27 }
 0x141   :  { %271 = vrsqrt.f32 %v176_v29  ;;  %vm184_vm0 = vcmp.eq.f32.partialorder %v176_v29, inf  ;;  %v187_v38 = vand.u32 2147483648, %v176_v29  ;;  %vm186_vm1 = vcmp.eq.f32.partialorder %v176_v29, 0.0 }
 0x144   :  { %v161_v30 = vpop.f32.mrf.mxu2 }
 0x147   :  { %v272_v31 = vpop.eup %271 }
 0x148   :  { %v178_v32 = vmul.f32 %v272_v31, %v176_v29 }
 0x14a   :  { %v179_v33 = vmul.f32 %v272_v31, %v178_v32 }
 0x14c   :  { %v180_v34 = vmul.f32 0.5, %v179_v33 }
 0x14e   :  { %v181_v35 = vsub.f32 1.5, %v180_v34 }
 0x150   :  { %v182_v36 = vmul.f32 %v272_v31, %v181_v35 }
 0x152   :  { %v183_v37 = vmul.f32 %v182_v36, %v176_v29 }
 0x154   :  { %v185_v39 = vsel %vm184_vm0, %v176_v29, %v183_v37 }
 0x155   :  { %v188_v40 = vsel %vm186_vm1, %v187_v38, %v185_v39 }
 0x156   :  { %v189_v41 = vadd.f32 0.001, %v188_v40 }
 0x158   :  { %273 = vrcp.f32 %v189_v41 }
 0x15e   :  { %v274_v42 = vpop.eup %273 }
 0x15f   :  { %v191_v43 = vmul.f32 %v274_v42, %v189_v41 }
 0x161   :  { %v192_v44 = vsub.f32 2.0, %v191_v43 }
 0x163   :  { %v193_v45 = vmul.f32 %v274_v42, %v192_v44 }
 0x165   :  { %v194_v47 = vmul.f32 %v193_v45, %v144_v17 }
 0x167   :  { %v199_v49 = vmul.f32 %v269_v46, %v194_v47 }
 0x169   :  { %v204_v50 = vadd.f32 %v270_v48, %v199_v49 }
 0x16b   :  { %205 = vst [vmem:[#allocation7] sm:$0xff] %v204_v50 }
 0x16c   :  { %216 = dma.vmem_to_hbm [thread:$0]  %s212_s30, 128, %s214_s7, [#allocation4]  }
 0x16d   :  { %351 = dma.done.wait [#allocation4], 128  }
 0x16e   :  { %352 = vsyncadd [#allocation4], 4294967168 }
 0x16f   :  { %221 = vsyncpa [#allocation3], 1 }
 0x170   :  { %222 = vsyncpa [#allocation6], 1 }
 0x171   :  { %223 = vsyncpa [#allocation4], 1 }

</bundles_post_ra>
